<compile_context>
chip_gen: v7x
topology: tpu7x:2x2x1
jax: 0.10.0
libtpu: 0.0.40
codegen_flags: <defaults>
</compile_context>

<pallas_src>
import math
import numpy as np
import jax
import jax.numpy as jnp
from jax.experimental import pallas as pl
from jax.experimental.pallas import tpu as pltpu


# ----------------------------------------------------------------------------
# pe buffer construction (faithful to the PyTorch module, including the quirky
# empty `range(embed_dim, 2)` loop -> all-zero buffer for embed_dim >= 2).
# ----------------------------------------------------------------------------
def build_pe_np(max_seq_len: int, embed_dim: int) -> np.ndarray:
    pe = np.zeros((max_seq_len, embed_dim), dtype=np.float32)
    for pos in range(max_seq_len):
        for i in range(embed_dim, 2):  # identical (empty) bounds as the reference
            pe[pos, i] = math.sin(pos / 10000 ** (2 * i / embed_dim))
            pe[pos, i + 1] = math.cos(pos / 10000 ** (2 * i / embed_dim))
    return pe[None, :, :]  # (1, max_seq_len, embed_dim)


def build_pe(max_seq_len: int, embed_dim: int) -> jnp.ndarray:
    return jnp.asarray(build_pe_np(max_seq_len, embed_dim))


# ----------------------------------------------------------------------------
# Kernel: one VPU add per vreg; pe cast to x's dtype happens here (no separate
# XLA astype pass over pe per call).
# ----------------------------------------------------------------------------
def _add_kernel(x_ref, pe_ref, o_ref):
    o_ref[...] = (x_ref[...] + pe_ref[...]).astype(o_ref.dtype)


# ----------------------------------------------------------------------------
# Tile selection helpers.
# ----------------------------------------------------------------------------
def _pick_tile(dim: int, mult: int, target: int) -> int:
    """Largest t <= target with t % mult == 0 and dim % t == 0 (or full dim)."""
    if dim % mult != 0:
        return dim  # full extent: always legal (block dim == array dim)
    t = min(dim, max(mult, (target // mult) * mult))
    while dim % t != 0:
        t -= mult
    return t


def _shrink_tile(dim: int, t: int, mult: int) -> int:
    """Next smaller tile < t that divides dim and is a multiple of mult (else t)."""
    c = t - mult
    while c >= mult:
        if dim % c == 0:
            return c
        c -= mult
    return t


def _vmem_budget():
    """(per-buffer byte budget, vmem_limit_bytes or None), keyed off generation."""
    try:
        kind = jax.devices()[0].device_kind.lower()
    except Exception:
        kind = ""
    if "v7" in kind:                       # 64 MiB physical VMEM: 4 MiB tiles, 48 MiB cap
        return 4 * 1024 * 1024, 48 * 1024 * 1024
    if "v6" in kind:                       # 128 MiB physical VMEM: 4 MiB tiles, 64 MiB cap
        return 4 * 1024 * 1024, 64 * 1024 * 1024
    return 2 * 1024 * 1024, None           # v5e / unknown: stay under 16 MiB default scoped


# ----------------------------------------------------------------------------
# Wrapper: x (B, S, E) + pe (1, max_seq_len, E)[:, :S]
# ----------------------------------------------------------------------------
def position_embedding(x: jnp.ndarray, pe: jnp.ndarray, *, donate_x: bool = False) -> jnp.ndarray:
    B, S, E = x.shape
    assert pe.shape[0] == 1 and pe.shape[2] == E and S <= pe.shape[1]

    x_item = jnp.dtype(x.dtype).itemsize
    pe_item = jnp.dtype(pe.dtype).itemsize
    item = max(x_item, pe_item)                      # budget against the widest buffer
    sub_mult = {4: 8, 2: 16, 1: 32}.get(x_item, 8)   # sublane packing per dtype
    budget, vmem_limit = _vmem_budget()
    aliases = {0: 0} if donate_x else {}

    if E % 128 == 0 and S % sub_mult == 0:
        # ---- Path A: lane-dense 3-D tiling (realistic BERT shapes). ----
        # Byte-based caps: at most `budget` bytes per buffer tile.
        tE = _pick_tile(E, 128, max(128, budget // (sub_mult * item)))
        tS = _pick_tile(S, sub_mult, max(sub_mult, budget // (tE * item)))
        # Guarantee enough grid steps for megacore sharding + pipelining overlap.
        min_steps = 4
        while (S // tS) * (E // tE) * B < min_steps:
            new_tS = _shrink_tile(S, tS, sub_mult)
            if new_tS < tS:
                tS = new_tS
                continue
            new_tE = _shrink_tile(E, tE, 128)
            if new_tE < tE:
                tE = new_tE
                continue
            break
        grid = (S // tS, E // tE, B)  # batch innermost -> pe tile stays resident

        cp_kwargs = dict(dimension_semantics=("parallel", "parallel", "parallel"))
        if vmem_limit is not None:
            cp_kwargs["vmem_limit_bytes"] = vmem_limit

        return pl.pallas_call(
            _add_kernel,
            out_shape=jax.ShapeDtypeStruct((B, S, E), x.dtype),
            grid=grid,
            in_specs=[
                pl.BlockSpec((1, tS, tE), lambda s, e, b: (b, s, e)),
                # Window straight into the full (1, max_seq_len, E) pe buffer:
                # no pe[:, :S] slice/copy outside the kernel.
                pl.BlockSpec((1, tS, tE), lambda s, e, b: (0, s, e)),
            ],
            out_specs=pl.BlockSpec((1, tS, tE), lambda s, e, b: (b, s, e)),
            compiler_params=pltpu.CompilerParams(**cp_kwargs),
            cost_estimate=pl.CostEstimate(
                flops=B * S * E,
                transcendentals=0,
                bytes_accessed=2 * B * S * E * x_item + S * E * pe_item),
            input_output_aliases=aliases,
        )(x, pe)

    # ---- Path B: small / ragged E (< 128 or not a multiple of 128). ----
    # Flatten (S, E) -> F = S*E so the output last dim is a multiple of 128 where
    # possible (lane-dense stores instead of masked vst.msk on E lanes).  The pe
    # slice+reshape is only S*E elements (tiny); the x/out reshape is layout-free.
    F = S * E
    x2 = x.reshape(B, F)
    pe2 = pe[:, :S, :].reshape(1, F)
    if F % 128 == 0:
        lane_target = max(128, budget // (max(B, 1) * item))
        tF = _pick_tile(F, 128, lane_target)
    else:
        tF = F  # full extent; legal because block dim == array dim
    grid = (F // tF,)
    out = pl.pallas_call(
        _add_kernel,
        out_shape=jax.ShapeDtypeStruct((B, F), x.dtype),
        grid=grid,
        in_specs=[
            pl.BlockSpec((B, tF), lambda f: (0, f)),
            pl.BlockSpec((1, tF), lambda f: (0, f)),  # broadcasts over B sublanes
        ],
        out_specs=pl.BlockSpec((B, tF), lambda f: (0, f)),
        compiler_params=pltpu.CompilerParams(dimension_semantics=("parallel",)),
        cost_estimate=pl.CostEstimate(
            flops=B * F,
            transcendentals=0,
            bytes_accessed=2 * B * F * x_item + F * pe_item),
        input_output_aliases=aliases,
    )(x2, pe2)
    return out.reshape(B, S, E)


# ----------------------------------------------------------------------------
# Module-level wrapper mirroring the PyTorch class (with the zero-pe fast path).
# ----------------------------------------------------------------------------
class PositionEmbedding:
    def __init__(self, max_seq_len: int, embed_dim: int):
        self.max_seq_len = max_seq_len
        self.embed_dim = embed_dim
        pe_np = build_pe_np(max_seq_len, embed_dim)
        # Host-side, build-time check: the reference buffer is provably all-zero
        # for embed_dim >= 2, so forward() is the identity -> skip the kernel.
        self.pe_is_zero = not np.any(pe_np)
        self.pe = jnp.asarray(pe_np)

    def __call__(self, x: jnp.ndarray, *, force_kernel: bool = False) -> jnp.ndarray:
        if self.pe_is_zero and not force_kernel:
            return x  # exact reference semantics, zero HBM traffic
        return position_embedding(x, self.pe)


if __name__ == "__main__":
    # ---- Path B shapes (toy, E < 128) implied by the module's forward ----
    max_seq_len, embed_dim = 16, 32
    batch, seq_len = 2, 8
    key = jax.random.PRNGKey(0)
    k1, k2, k3, k4 = jax.random.split(key, 4)

    x = jax.random.normal(k1, (batch, seq_len, embed_dim), dtype=jnp.float32)

    # (a) Faithful module: pe is provably zero -> forward short-circuits to x.
    mod = PositionEmbedding(max_seq_len, embed_dim)
    out_mod = jax.block_until_ready(mod(x))
    np.testing.assert_allclose(np.asarray(out_mod), np.asarray(x), rtol=0, atol=0)

    # (b) Exercise the kernel with the module's (zero) pe buffer.
    out = jax.block_until_ready(position_embedding(x, mod.pe))
    ref = x + mod.pe[:, :seq_len]
    np.testing.assert_allclose(np.asarray(out), np.asarray(ref), rtol=1e-6, atol=1e-6)

    # (c) Exercise the kernel with a non-zero pe so the add itself is verified.
    pe_rand = jax.random.normal(k2, (1, max_seq_len, embed_dim), dtype=jnp.float32)
    out_b = jax.block_until_ready(position_embedding(x, pe_rand))
    ref_b = x + pe_rand[:, :seq_len]
    np.testing.assert_allclose(np.asarray(out_b), np.asarray(ref_b), rtol=1e-6, atol=1e-6)

    # ---- Path A: lane-dense 3-D tiled path (E a multiple of 128) ----
    B2, S2, E2, MAX2 = 2, 16, 128, 32
    x2 = jax.random.normal(k3, (B2, S2, E2), dtype=jnp.float32)
    pe2 = jax.random.normal(k4, (1, MAX2, E2), dtype=jnp.float32)
    out2 = jax.block_until_ready(position_embedding(x2, pe2))
    ref2 = x2 + pe2[:, :S2]
    np.testing.assert_allclose(np.asarray(out2), np.asarray(ref2), rtol=1e-6, atol=1e-6)

    print("KERNEL_OK")
</pallas_src>

<mosaic_0001>
module attributes {stable_mosaic.version = 11 : i64} {
  func.func @_add_kernel(%arg0: i32, %arg1: memref<2x256xf32, #tpu.memory_space<vmem>>, %arg2: memref<1x256xf32, #tpu.memory_space<vmem>>, %arg3: memref<2x256xf32, #tpu.memory_space<vmem>>) attributes {dimension_semantics = [#tpu.dimension_semantics<parallel>], iteration_bounds = array<i64: 1>, scalar_prefetch = 0 : i64, scratch_operands = 0 : i64, tpu.core_type = #tpu.core_type<tc>, window_params = [{transform_indices = @transform_0, window_bounds = array<i64: 2, 256>}, {transform_indices = @transform_1, window_bounds = array<i64: 1, 256>}, {transform_indices = @transform_2, window_bounds = array<i64: 2, 256>}]} {
    %c0 = arith.constant 0 : index
    %c0_0 = arith.constant 0 : index
    %0 = vector.load %arg1[%c0, %c0_0] : memref<2x256xf32, #tpu.memory_space<vmem>>, vector<2x256xf32>
    %c0_1 = arith.constant 0 : index
    %c0_2 = arith.constant 0 : index
    %1 = vector.load %arg2[%c0_1, %c0_2] : memref<1x256xf32, #tpu.memory_space<vmem>>, vector<1x256xf32>
    %2 = vector.broadcast %1 : vector<1x256xf32> to vector<2x256xf32>
    %3 = arith.addf %0, %2 : vector<2x256xf32>
    %c0_3 = arith.constant 0 : index
    %c0_4 = arith.constant 0 : index
    %4 = vector.load %arg3[%c0_3, %c0_4] : memref<2x256xf32, #tpu.memory_space<vmem>>, vector<2x256xf32>
    tpu.vector_store %arg3[%c0_3, %c0_4], %3 {strides = array<i32>} : memref<2x256xf32, #tpu.memory_space<vmem>>, vector<2x256xf32>,
    return
  }
  func.func @transform_0(%arg0: i32) -> (i32, i32) {
    %c0_i32 = arith.constant 0 : i32
    %c0_i32_0 = arith.constant 0 : i32
    return %c0_i32, %arg0 : i32, i32
  }
  func.func @transform_1(%arg0: i32) -> (i32, i32) {
    %c0_i32 = arith.constant 0 : i32
    %c0_i32_0 = arith.constant 0 : i32
    return %c0_i32, %arg0 : i32, i32
  }
  func.func @transform_2(%arg0: i32) -> (i32, i32) {
    %c0_i32 = arith.constant 0 : i32
    %c0_i32_0 = arith.constant 0 : i32
    return %c0_i32, %arg0 : i32, i32
  }
}

</mosaic_0001>

<bundles_post_ra>
// kernel: tpu_custom_call.1
= control target key start
LH: loop header
LB: loop body
LE: loop exit
PB: predicated region body
PF: predicated region fallthrough
CT: control target
= control target key end

     0   :  { %7 = vsyncpa [#allocation3], 0  ;;  %s157_s0 = inlined_call_operand.hbm [shape: f32[2,256], index: 0, kind: input, shape index: {}]   ;;  %s158_s1 = inlined_call_operand.vmem [shape: f32[1,256], index: 1, kind: input, shape index: {}]   ;;  %s159_s2 = inlined_call_operand.hbm [shape: f32[2,256], index: 2, kind: output, shape index: {}]  }
   0x1   :  { %8 = vsyncpa [#allocation4], 0  ;;  %s112_s9 = smov [#allocation2]   ;;  %s64_s13 = scalar_lea.hbm %s157_s0, 64 }
   0x2   :  { %s15_s10 = sshll.u32 %s112_s9, 4  ;;  %p65_p0 = scmp.ne.s32.totalorder %s157_s0, %s64_s13  ;;  %s16_s10 = int_to_ptr.vmem [resolvable:$true] %s15_s10 }
   0x3   :  { %p68_p1 = scmp.lt.u32.totalorder %s64_s13, %s157_s0 }
   0x5   :  { %p70_p2 = pnand %p68_p1, %p65_p0 }
   0x7   :  { %73 = shalt.err (!%p70_p2)
}
   0x8   :  { %s74_s18 = scalar_lea.vmem %s16_s10, 64  ;;  %p79_p4 = scmp.lt.s32.totalorder %s16_s10, %s16_s10 }
   0x9   :  { %p75_p3 = scmp.ne.s32.totalorder %s16_s10, %s74_s18  ;;  %p80_p5 = scmp.lt.s32.totalorder %s74_s18, %s74_s18 }
   0xb   :  { %p81_p6 = por %p80_p5, %p79_p4 }
   0xd   :  { %p82_p7 = pnand %p81_p6, %p75_p3 }
   0xf   :  { %85 = shalt.err (!%p82_p7)
}
  0x10   :  { %18 = dma.hbm_to_vmem [thread:$0]  %s157_s0, 64, %s16_s10, [#allocation3]  }
  0x11   :  { %108 = dma.done.wait [#allocation3], 64  }
  0x12   :  { %109 = vsyncadd [#allocation3], 4294967232  ;;  %v27_v0 = vlaneseq  ;;  %v113_v1 = vmov 1983009808   ;;  %v25_v7 = vld [vmem:[%s158_s1] sm:$0x3] }
  0x13   :  { %v37_v2 = vunpack.c.l.s4 %v113_v1  ;;  %v24_v12 = vld [vmem:[#allocation2] sm:$0xf]  ;;  %s114_s23 = smov [#allocation5]  }
  0x14   :  { %v28_v3 = vshrl.u32 %v27_v0, 7  ;;  %s52_s0 = sshll.u32 %s114_s23, 4  ;;  %s53_s0 = int_to_ptr.vmem [resolvable:$true] %s52_s0 }
  0x15   :  { %v38_v6 = vunpack.c.0.s8 %v37_v2  ;;  %s86_s24 = scalar_lea.vmem %s53_s0, 64  ;;  %p91_p9 = scmp.lt.s32.totalorder %s53_s0, %s53_s0 }
  0x16   :  { %v29_v4 = vsub.s32 0, %v28_v3  ;;  %v33_v5 = vsub.s32 1, %v28_v3  ;;  %p87_p8 = scmp.ne.s32.totalorder %s53_s0, %s86_s24  ;;  %p92_p10 = scmp.lt.s32.totalorder %s86_s24, %s86_s24 }
  0x17   :  { %v41_v10 = vsub.s32 %v38_v6, %v28_v3 }
  0x18   :  { %v30_v8 = vrot.slane %v25_v7, %v29_v4  ;;  %v34_v9 = vrot.slane %v25_v7, %v33_v5  ;;  %p93_p11 = por %p92_p10, %p91_p9 }
  0x1a   :  { %v35_v11 = vcombine.low %v30_v8, %v34_v9  ;;  %p94_p12 = pnand %p93_p11, %p87_p8 }
  0x1c   :  { %v42_v13 = vrot.slane %v35_v11, %v41_v10 }
  0x1e   :  { %v44_v14 = vadd.f32 %v42_v13, %v24_v12 }
  0x20   :  { %45 = vst [vmem:[#allocation5] sm:$0xf] %v44_v14 }
  0x21   :  { %97 = shalt.err (!%p94_p12)
}
  0x22   :  { %s98_s26 = scalar_lea.hbm %s159_s2, 64 }
  0x23   :  { %p99_p13 = scmp.ne.s32.totalorder %s159_s2, %s98_s26  ;;  %p102_p0 = scmp.lt.u32.totalorder %s98_s26, %s159_s2 }
  0x25   :  { %p104_p1 = pnand %p102_p0, %p99_p13 }
  0x27   :  { %107 = shalt.err (!%p104_p1)
}
  0x28   :  { %55 = dma.vmem_to_hbm [thread:$0]  %s53_s0, 64, %s159_s2, [#allocation4]  }
  0x29   :  { %110 = dma.done.wait [#allocation4], 64  }
  0x2a   :  { %111 = vsyncadd [#allocation4], 4294967232 }
  0x2b   :  { %59 = vsyncpa [#allocation3], 1 }
  0x2c   :  { %60 = vsyncpa [#allocation4], 1 }

</bundles_post_ra>
